<compile_context>
chip_gen: v5e
topology: v5e:2x2
jax: 0.10.0
libtpu: 0.0.40
codegen_flags: <defaults>
</compile_context>

<pallas_src>
import jax
import jax.numpy as jnp
from jax import lax
from jax.experimental import pallas as pl
from jax.experimental.pallas import tpu as pltpu

_LANES = 128
_MAX_CHUNK_ROWS = 512        # 512 rows * 128 lanes = 65536 rays per grid step


def _round_up(x: int, m: int) -> int:
    return (x + m - 1) // m * m


def _cdiv(a: int, b: int) -> int:
    return (a + b - 1) // b


def _num_tensorcores() -> int:
    """Best-effort TensorCores-per-device: 1 on v5e/v6e, 2 on megacore/v7x."""
    try:
        dev = jax.devices()[0]
        if dev.platform != "tpu":
            return 1
        kind = str(getattr(dev, "device_kind", "")).lower()
        if any(s in kind for s in ("v5 lite", "v5e", "v6 lite", "v6e")):
            return 1
        return 2
    except Exception:   # defensive: never fail sizing because of introspection
        return 1


def _block_nerf_partial_kernel(counts_ref, rgb_p_ref, rgb_t_ref,
                               d_p_ref, d_t_ref, g_ref, out_ref):
    """One grid step: fold a chunk of rays into the resident (4,8,128) sums."""
    c = pl.program_id(0)
    i = pl.program_id(1)
    step = c * pl.num_programs(1) + i

    ray_rows = d_p_ref.shape[0]          # chunk_rows (rays/128 in this block)
    rgb_rows = rgb_p_ref.shape[0]        # 3 * chunk_rows

    n_rgb = counts_ref[0]                # total RGB elements (3 * n_rays)
    n_depth = counts_ref[1]              # total depth entries
    n_grad = counts_ref[2]               # total gradient rows (rays * samples)

    @pl.when(i == 0)
    def _init():
        out_ref[...] = jnp.zeros_like(out_ref)

    # ---------------- RGB squared error (dense lane slab) ----------------
    lin_rgb = (lax.broadcasted_iota(jnp.int32, (rgb_rows, _LANES), 0) * _LANES
               + lax.broadcasted_iota(jnp.int32, (rgb_rows, _LANES), 1))
    rgb_rem = n_rgb - step * (rgb_rows * _LANES)     # scalar; <=0 for OOB tail
    diff = rgb_p_ref[...] - rgb_t_ref[...]
    rgb_sq = jnp.where(lin_rgb < rgb_rem, diff * diff, 0.0)
    out_ref[0, 0] += jnp.sum(rgb_sq.reshape(-1, 8, _LANES), axis=0)

    # -------------- masked depth squared error + valid count --------------
    lin_ray = (lax.broadcasted_iota(jnp.int32, (ray_rows, _LANES), 0) * _LANES
               + lax.broadcasted_iota(jnp.int32, (ray_rows, _LANES), 1))
    ray_base = step * (ray_rows * _LANES)
    td = d_t_ref[...]
    d_valid = (lin_ray < (n_depth - ray_base)) & (td > 0.0)
    dd = d_p_ref[...] - td
    d_sq = jnp.where(d_valid, dd * dd, 0.0)
    out_ref[0, 1] += jnp.sum(d_sq.reshape(-1, 8, _LANES), axis=0)
    out_ref[0, 2] += jnp.sum(
        jnp.where(d_valid, 1.0, 0.0).reshape(-1, 8, _LANES), axis=0)

    # ------------------- eikonal: (||grad|| - 1)^2 -------------------
    gx = g_ref[0]                        # (ray_rows, 128) dense tiles
    gy = g_ref[1]
    gz = g_ref[2]
    gnorm = jnp.sqrt(gx * gx + gy * gy + gz * gz)
    err = gnorm - 1.0
    eik_sq = jnp.where(lin_ray < (n_grad - ray_base), err * err, 0.0)
    out_ref[0, 3] += jnp.sum(eik_sq.reshape(-1, 8, _LANES), axis=0)


def block_nerf_loss(pred_rgb, target_rgb, pred_depth, target_depth, gradients,
                    rgb_loss_weight=1.0, depth_loss_weight=0.1,
                    eikonal_loss_weight=0.1):
    """Pallas implementation of BlockNeRFLoss.forward (all loss terms present)."""
    pred_rgb = jnp.asarray(pred_rgb, jnp.float32)
    target_rgb = jnp.asarray(target_rgb, jnp.float32)
    pred_depth = jnp.asarray(pred_depth, jnp.float32).reshape(-1)
    target_depth = jnp.asarray(target_depth, jnp.float32).reshape(-1)
    gradients = jnp.asarray(gradients, jnp.float32).reshape(-1, 3)

    n_rgb_elems = pred_rgb.size          # MSE denominator: all RGB elements
    n_depth = pred_depth.shape[0]
    n_grad = gradients.shape[0]          # eikonal denominator (rays*samples)

    # ---- lane-dense views: pad only to the next 128-element boundary ----
    def _slab(flat):
        n = flat.shape[0]
        rows = _cdiv(max(n, 1), _LANES)
        if rows * _LANES != n:
            flat = jnp.pad(flat, (0, rows * _LANES - n))
        return flat.reshape(rows, _LANES), rows

    rgb_p, rgb_rows_total = _slab(pred_rgb.reshape(-1))
    rgb_t, _ = _slab(target_rgb.reshape(-1))
    d_p, d_rows_total = _slab(pred_depth)
    d_t, _ = _slab(target_depth)

    g_rows_total = _cdiv(max(n_grad, 1), _LANES)
    g = gradients
    if g_rows_total * _LANES != n_grad:
        g = jnp.pad(g, ((0, g_rows_total * _LANES - n_grad), (0, 0)))
    # Single remaining wrapper copy: transpose to a dense (3, rows, 128) layout
    # so the in-kernel eikonal path is full-width (all 8 sublanes / 128 lanes).
    g3 = g.T.reshape(3, g_rows_total, _LANES)

    # ---- grid sizing: big chunks so the ~0.35us/step overhead is amortised ----
    rows_needed = max(_cdiv(rgb_rows_total, 3), d_rows_total, g_rows_total, 1)
    ncores = min(_num_tensorcores(), max(1, rows_needed // 8))
    rows_per_core = _cdiv(rows_needed, ncores)
    inner = _cdiv(rows_per_core, _MAX_CHUNK_ROWS)
    chunk_rows = _round_up(_cdiv(rows_per_core, inner), 8)
    rgb_chunk_rows = 3 * chunk_rows

    counts = jnp.array([n_rgb_elems, n_depth, n_grad], dtype=jnp.int32)

    def _rgb_idx(c, i, counts_ref):
        return (c * inner + i, 0)

    def _ray_idx(c, i, counts_ref):
        return (c * inner + i, 0)

    def _g_idx(c, i, counts_ref):
        return (0, c * inner + i, 0)

    def _out_idx(c, i, counts_ref):
        return (c, 0, 0, 0)

    out = pl.pallas_call(
        _block_nerf_partial_kernel,
        out_shape=jax.ShapeDtypeStruct((ncores, 4, 8, _LANES), jnp.float32),
        grid_spec=pltpu.PrefetchScalarGridSpec(
            num_scalar_prefetch=1,
            grid=(ncores, inner),
            in_specs=[
                pl.BlockSpec((rgb_chunk_rows, _LANES), _rgb_idx),
                pl.BlockSpec((rgb_chunk_rows, _LANES), _rgb_idx),
                pl.BlockSpec((chunk_rows, _LANES), _ray_idx),
                pl.BlockSpec((chunk_rows, _LANES), _ray_idx),
                pl.BlockSpec((3, chunk_rows, _LANES), _g_idx),
            ],
            out_specs=pl.BlockSpec((1, 4, 8, _LANES), _out_idx),
        ),
        compiler_params=pltpu.CompilerParams(
            dimension_semantics=("parallel", "arbitrary")),
    )(counts, rgb_p, rgb_t, d_p, d_t, g3)

    # ---- tiny cross-core combine + epilogue (4 divides + weighting) ----
    sums = jnp.sum(out, axis=(0, 2, 3))      # [rgb_sq, depth_sq, n_valid, eik_sq]
    rgb_loss = sums[0] / jnp.float32(n_rgb_elems)
    n_valid = sums[2]
    depth_loss = jnp.where(n_valid > 0.0,
                           sums[1] / jnp.maximum(n_valid, 1.0),
                           jnp.float32(0.0))
    eik_loss = sums[3] / jnp.float32(n_grad)
    total = (jnp.float32(rgb_loss_weight) * rgb_loss
             + jnp.float32(depth_loss_weight) * depth_loss
             + jnp.float32(eikonal_loss_weight) * eik_loss)

    return {
        "rgb_loss": rgb_loss,
        "depth_loss": depth_loss,
        "eikonal_loss": eik_loss,
        "total_loss": total,
    }


def _reference_loss(pred_rgb, target_rgb, pred_depth, target_depth, gradients,
                    rgb_w=1.0, depth_w=0.1, eik_w=0.1):
    """Plain-JAX reference mirroring the PyTorch module."""
    rgb = jnp.mean((pred_rgb - target_rgb) ** 2)
    pd = jnp.reshape(pred_depth, (-1,))
    td = jnp.reshape(target_depth, (-1,))
    mask = td > 0
    n_valid = jnp.sum(mask)
    d_sum = jnp.sum(jnp.where(mask, (pd - td) ** 2, 0.0))
    depth = jnp.where(n_valid > 0, d_sum / jnp.maximum(n_valid, 1), 0.0)
    gnorm = jnp.linalg.norm(gradients, axis=-1)
    eik = jnp.mean((gnorm - 1.0) ** 2)
    total = rgb_w * rgb + depth_w * depth + eik_w * eik
    return rgb, depth, eik, total


def _check_case(pred_rgb, target_rgb, pred_depth, target_depth, gradients):
    losses = block_nerf_loss(pred_rgb, target_rgb, pred_depth, target_depth,
                             gradients)
    losses = jax.tree_util.tree_map(jax.block_until_ready, losses)
    ref_rgb, ref_depth, ref_eik, ref_total = _reference_loss(
        pred_rgb, target_rgb, pred_depth, target_depth, gradients)
    assert jnp.allclose(losses["rgb_loss"], ref_rgb, atol=1e-5, rtol=1e-5)
    assert jnp.allclose(losses["depth_loss"], ref_depth, atol=1e-5, rtol=1e-5)
    assert jnp.allclose(losses["eikonal_loss"], ref_eik, atol=1e-5, rtol=1e-5)
    assert jnp.allclose(losses["total_loss"], ref_total, atol=1e-5, rtol=1e-5)
    return losses


if __name__ == "__main__":
    key = jax.random.PRNGKey(0)
    k1, k2, k3, k4, k5 = jax.random.split(key, 5)

    # Case 1: lane-aligned ray count (zero wrapper-side pads).
    N = 256
    pred_rgb = jax.random.uniform(k1, (N, 3), dtype=jnp.float32)
    target_rgb = jax.random.uniform(k2, (N, 3), dtype=jnp.float32)
    pred_depth = jax.random.uniform(k3, (N,), dtype=jnp.float32) * 5.0
    target_depth = jax.random.uniform(k4, (N,), dtype=jnp.float32,
                                      minval=-2.0, maxval=5.0)
    gradients = jax.random.normal(k5, (N, 3), dtype=jnp.float32)
    _check_case(pred_rgb, target_rgb, pred_depth, target_depth, gradients)

    # Case 2: non-aligned ray count + per-sample (N, S, 3) gradients,
    # exercising the in-kernel tail masking and per-term counts.
    k6, k7, k8, k9, k10 = jax.random.split(jax.random.PRNGKey(1), 5)
    M = 300
    pred_rgb2 = jax.random.uniform(k6, (M, 3), dtype=jnp.float32)
    target_rgb2 = jax.random.uniform(k7, (M, 3), dtype=jnp.float32)
    pred_depth2 = jax.random.uniform(k8, (M,), dtype=jnp.float32) * 5.0
    target_depth2 = jax.random.uniform(k9, (M,), dtype=jnp.float32,
                                       minval=-2.0, maxval=5.0)
    gradients2 = jax.random.normal(k10, (M, 2, 3), dtype=jnp.float32)
    _check_case(pred_rgb2, target_rgb2, pred_depth2, target_depth2, gradients2)

    print("KERNEL_OK")
</pallas_src>

<mosaic_0001>
module attributes {stable_mosaic.version = 11 : i64} {
  func.func @_block_nerf_partial_kernel(%arg0: i32, %arg1: i32, %arg2: memref<3xi32, #tpu.memory_space<smem>>, %arg3: memref<24x128xf32, #tpu.memory_space<vmem>>, %arg4: memref<24x128xf32, #tpu.memory_space<vmem>>, %arg5: memref<8x128xf32, #tpu.memory_space<vmem>>, %arg6: memref<8x128xf32, #tpu.memory_space<vmem>>, %arg7: memref<3x8x128xf32, #tpu.memory_space<vmem>>, %arg8: memref<1x4x8x128xf32, #tpu.memory_space<vmem>>) attributes {dimension_semantics = [#tpu.dimension_semantics<parallel>, #tpu.dimension_semantics<arbitrary>], iteration_bounds = array<i64: 1, 1>, scalar_prefetch = 1 : i64, scratch_operands = 0 : i64, tpu.core_type = #tpu.core_type<tc>, window_params = [{transform_indices = @transform_0, window_bounds = array<i64: 24, 128>}, {transform_indices = @transform_1, window_bounds = array<i64: 24, 128>}, {transform_indices = @transform_2, window_bounds = array<i64: 8, 128>}, {transform_indices = @transform_3, window_bounds = array<i64: 8, 128>}, {transform_indices = @transform_4, window_bounds = array<i64: 3, 8, 128>}, {transform_indices = @transform_5, window_bounds = array<i64: 1, 4, 8, 128>}]} {
    %c1_i32 = arith.constant 1 : i32
    %0 = arith.muli %arg0, %c1_i32 : i32
    %1 = arith.addi %0, %arg1 : i32
    %c0 = arith.constant 0 : index
    %2 = memref.load %arg2[%c0] : memref<3xi32, #tpu.memory_space<smem>>
    %c1 = arith.constant 1 : index
    %3 = memref.load %arg2[%c1] : memref<3xi32, #tpu.memory_space<smem>>
    %c2 = arith.constant 2 : index
    %4 = memref.load %arg2[%c2] : memref<3xi32, #tpu.memory_space<smem>>
    %c0_i32 = arith.constant 0 : i32
    %5 = arith.cmpi eq, %arg1, %c0_i32 : i32
    %6 = arith.extui %5 : i1 to i32
    %c0_i32_0 = arith.constant 0 : i32
    %7 = arith.cmpi ne, %6, %c0_i32_0 : i32
    scf.if %7 {
      %cst_60 = arith.constant 0.000000e+00 : f32
      %96 = vector.broadcast %cst_60 : f32 to vector<1x4x8x128xf32>
      %c0_61 = arith.constant 0 : index
      %c0_62 = arith.constant 0 : index
      %c0_63 = arith.constant 0 : index
      %c0_64 = arith.constant 0 : index
      %97 = vector.load %arg8[%c0_61, %c0_62, %c0_63, %c0_64] : memref<1x4x8x128xf32, #tpu.memory_space<vmem>>, vector<1x4x8x128xf32>
      tpu.vector_store %arg8[%c0_61, %c0_62, %c0_63, %c0_64], %96 {strides = array<i32>} : memref<1x4x8x128xf32, #tpu.memory_space<vmem>>, vector<1x4x8x128xf32>,
    } else {
    }
    %8 = tpu.iota {dimensions = array<i32: 0>} : vector<24x128xi32>
    %c128_i32 = arith.constant 128 : i32
    %9 = vector.broadcast %c128_i32 : i32 to vector<24x128xi32>
    %10 = arith.muli %8, %9 : vector<24x128xi32>
    %11 = tpu.iota {dimensions = array<i32: 1>} : vector<24x128xi32>
    %12 = arith.addi %10, %11 : vector<24x128xi32>
    %c3072_i32 = arith.constant 3072 : i32
    %13 = arith.muli %1, %c3072_i32 : i32
    %14 = arith.subi %2, %13 : i32
    %c0_1 = arith.constant 0 : index
    %c0_2 = arith.constant 0 : index
    %15 = vector.load %arg3[%c0_1, %c0_2] : memref<24x128xf32, #tpu.memory_space<vmem>>, vector<24x128xf32>
    %c0_3 = arith.constant 0 : index
    %c0_4 = arith.constant 0 : index
    %16 = vector.load %arg4[%c0_3, %c0_4] : memref<24x128xf32, #tpu.memory_space<vmem>>, vector<24x128xf32>
    %17 = arith.subf %15, %16 : vector<24x128xf32>
    %18 = vector.broadcast %14 : i32 to vector<24x128xi32>
    %19 = arith.cmpi slt, %12, %18 : vector<24x128xi32>
    %20 = arith.mulf %17, %17 : vector<24x128xf32>
    %cst = arith.constant 0.000000e+00 : f32
    %21 = vector.broadcast %cst : f32 to vector<24x128xf32>
    %22 = arith.select %19, %20, %21 : vector<24x128xi1>, vector<24x128xf32>
    %c0_5 = arith.constant 0 : index
    %c0_6 = arith.constant 0 : index
    %c0_7 = arith.constant 0 : index
    %c0_8 = arith.constant 0 : index
    %23 = vector.load %arg8[%c0_5, %c0_6, %c0_7, %c0_8] : memref<1x4x8x128xf32, #tpu.memory_space<vmem>>, vector<1x1x8x128xf32>
    %24 = vector.shape_cast %23 : vector<1x1x8x128xf32> to vector<8x128xf32>
    %25 = vector.shape_cast %22 : vector<24x128xf32> to vector<3x8x128xf32>
    %cst_9 = arith.constant dense<0.000000e+00> : vector<8x128xf32>
    %26 = vector.multi_reduction <add>, %25, %cst_9 [0] : vector<3x8x128xf32> to vector<8x128xf32>
    %27 = arith.addf %24, %26 : vector<8x128xf32>
    %c0_10 = arith.constant 0 : index
    %c0_11 = arith.constant 0 : index
    %c0_12 = arith.constant 0 : index
    %c0_13 = arith.constant 0 : index
    %28 = vector.load %arg8[%c0_10, %c0_11, %c0_12, %c0_13] : memref<1x4x8x128xf32, #tpu.memory_space<vmem>>, vector<1x1x8x128xf32>
    %29 = vector.shape_cast %28 : vector<1x1x8x128xf32> to vector<8x128xf32>
    %30 = vector.shape_cast %27 : vector<8x128xf32> to vector<1x1x8x128xf32>
    tpu.vector_store %arg8[%c0_10, %c0_11, %c0_12, %c0_13], %30 {strides = array<i32>} : memref<1x4x8x128xf32, #tpu.memory_space<vmem>>, vector<1x1x8x128xf32>,
    %31 = tpu.iota {dimensions = array<i32: 0>} : vector<8x128xi32>
    %c128_i32_14 = arith.constant 128 : i32
    %32 = vector.broadcast %c128_i32_14 : i32 to vector<8x128xi32>
    %33 = arith.muli %31, %32 : vector<8x128xi32>
    %34 = tpu.iota {dimensions = array<i32: 1>} : vector<8x128xi32>
    %35 = arith.addi %33, %34 : vector<8x128xi32>
    %c1024_i32 = arith.constant 1024 : i32
    %36 = arith.muli %1, %c1024_i32 : i32
    %c0_15 = arith.constant 0 : index
    %c0_16 = arith.constant 0 : index
    %37 = vector.load %arg6[%c0_15, %c0_16] : memref<8x128xf32, #tpu.memory_space<vmem>>, vector<8x128xf32>
    %38 = arith.subi %3, %36 : i32
    %39 = vector.broadcast %38 : i32 to vector<8x128xi32>
    %40 = arith.cmpi slt, %35, %39 : vector<8x128xi32>
    %cst_17 = arith.constant 0.000000e+00 : f32
    %41 = vector.broadcast %cst_17 : f32 to vector<8x128xf32>
    %42 = arith.cmpf ogt, %37, %41 : vector<8x128xf32>
    %43 = arith.andi %40, %42 : vector<8x128xi1>
    %c0_18 = arith.constant 0 : index
    %c0_19 = arith.constant 0 : index
    %44 = vector.load %arg5[%c0_18, %c0_19] : memref<8x128xf32, #tpu.memory_space<vmem>>, vector<8x128xf32>
    %45 = arith.subf %44, %37 : vector<8x128xf32>
    %46 = arith.mulf %45, %45 : vector<8x128xf32>
    %cst_20 = arith.constant 0.000000e+00 : f32
    %47 = vector.broadcast %cst_20 : f32 to vector<8x128xf32>
    %48 = arith.select %43, %46, %47 : vector<8x128xi1>, vector<8x128xf32>
    %c0_21 = arith.constant 0 : index
    %c1_22 = arith.constant 1 : index
    %c0_23 = arith.constant 0 : index
    %c0_24 = arith.constant 0 : index
    %49 = vector.load %arg8[%c0_21, %c1_22, %c0_23, %c0_24] : memref<1x4x8x128xf32, #tpu.memory_space<vmem>>, vector<1x1x8x128xf32>
    %50 = vector.shape_cast %49 : vector<1x1x8x128xf32> to vector<8x128xf32>
    %51 = vector.shape_cast %48 : vector<8x128xf32> to vector<1x8x128xf32>
    %cst_25 = arith.constant dense<0.000000e+00> : vector<8x128xf32>
    %52 = vector.multi_reduction <add>, %51, %cst_25 [0] : vector<1x8x128xf32> to vector<8x128xf32>
    %53 = arith.addf %50, %52 : vector<8x128xf32>
    %c0_26 = arith.constant 0 : index
    %c1_27 = arith.constant 1 : index
    %c0_28 = arith.constant 0 : index
    %c0_29 = arith.constant 0 : index
    %54 = vector.load %arg8[%c0_26, %c1_27, %c0_28, %c0_29] : memref<1x4x8x128xf32, #tpu.memory_space<vmem>>, vector<1x1x8x128xf32>
    %55 = vector.shape_cast %54 : vector<1x1x8x128xf32> to vector<8x128xf32>
    %56 = vector.shape_cast %53 : vector<8x128xf32> to vector<1x1x8x128xf32>
    tpu.vector_store %arg8[%c0_26, %c1_27, %c0_28, %c0_29], %56 {strides = array<i32>} : memref<1x4x8x128xf32, #tpu.memory_space<vmem>>, vector<1x1x8x128xf32>,
    %c0_30 = arith.constant 0 : index
    %c2_31 = arith.constant 2 : index
    %c0_32 = arith.constant 0 : index
    %c0_33 = arith.constant 0 : index
    %57 = vector.load %arg8[%c0_30, %c2_31, %c0_32, %c0_33] : memref<1x4x8x128xf32, #tpu.memory_space<vmem>>, vector<1x1x8x128xf32>
    %58 = vector.shape_cast %57 : vector<1x1x8x128xf32> to vector<8x128xf32>
    %cst_34 = arith.constant 1.000000e+00 : f32
    %cst_35 = arith.constant 0.000000e+00 : f32
    %59 = vector.broadcast %cst_34 : f32 to vector<8x128xf32>
    %60 = vector.broadcast %cst_35 : f32 to vector<8x128xf32>
    %61 = arith.select %43, %59, %60 : vector<8x128xi1>, vector<8x128xf32>
    %62 = vector.shape_cast %61 : vector<8x128xf32> to vector<1x8x128xf32>
    %cst_36 = arith.constant dense<0.000000e+00> : vector<8x128xf32>
    %63 = vector.multi_reduction <add>, %62, %cst_36 [0] : vector<1x8x128xf32> to vector<8x128xf32>
    %64 = arith.addf %58, %63 : vector<8x128xf32>
    %c0_37 = arith.constant 0 : index
    %c2_38 = arith.constant 2 : index
    %c0_39 = arith.constant 0 : index
    %c0_40 = arith.constant 0 : index
    %65 = vector.load %arg8[%c0_37, %c2_38, %c0_39, %c0_40] : memref<1x4x8x128xf32, #tpu.memory_space<vmem>>, vector<1x1x8x128xf32>
    %66 = vector.shape_cast %65 : vector<1x1x8x128xf32> to vector<8x128xf32>
    %67 = vector.shape_cast %64 : vector<8x128xf32> to vector<1x1x8x128xf32>
    tpu.vector_store %arg8[%c0_37, %c2_38, %c0_39, %c0_40], %67 {strides = array<i32>} : memref<1x4x8x128xf32, #tpu.memory_space<vmem>>, vector<1x1x8x128xf32>,
    %c0_41 = arith.constant 0 : index
    %c0_42 = arith.constant 0 : index
    %c0_43 = arith.constant 0 : index
    %68 = vector.load %arg7[%c0_41, %c0_42, %c0_43] : memref<3x8x128xf32, #tpu.memory_space<vmem>>, vector<1x8x128xf32>
    %69 = vector.shape_cast %68 : vector<1x8x128xf32> to vector<8x128xf32>
    %c1_44 = arith.constant 1 : index
    %c0_45 = arith.constant 0 : index
    %c0_46 = arith.constant 0 : index
    %70 = vector.load %arg7[%c1_44, %c0_45, %c0_46] : memref<3x8x128xf32, #tpu.memory_space<vmem>>, vector<1x8x128xf32>
    %71 = vector.shape_cast %70 : vector<1x8x128xf32> to vector<8x128xf32>
    %c2_47 = arith.constant 2 : index
    %c0_48 = arith.constant 0 : index
    %c0_49 = arith.constant 0 : index
    %72 = vector.load %arg7[%c2_47, %c0_48, %c0_49] : memref<3x8x128xf32, #tpu.memory_space<vmem>>, vector<1x8x128xf32>
    %73 = vector.shape_cast %72 : vector<1x8x128xf32> to vector<8x128xf32>
    %74 = arith.mulf %69, %69 : vector<8x128xf32>
    %75 = arith.mulf %71, %71 : vector<8x128xf32>
    %76 = arith.addf %74, %75 : vector<8x128xf32>
    %77 = arith.mulf %73, %73 : vector<8x128xf32>
    %78 = arith.addf %76, %77 : vector<8x128xf32>
    %79 = math.sqrt %78 : vector<8x128xf32>
    %cst_50 = arith.constant 1.000000e+00 : f32
    %80 = vector.broadcast %cst_50 : f32 to vector<8x128xf32>
    %81 = arith.subf %79, %80 : vector<8x128xf32>
    %82 = arith.subi %4, %36 : i32
    %83 = vector.broadcast %82 : i32 to vector<8x128xi32>
    %84 = arith.cmpi slt, %35, %83 : vector<8x128xi32>
    %85 = arith.mulf %81, %81 : vector<8x128xf32>
    %cst_51 = arith.constant 0.000000e+00 : f32
    %86 = vector.broadcast %cst_51 : f32 to vector<8x128xf32>
    %87 = arith.select %84, %85, %86 : vector<8x128xi1>, vector<8x128xf32>
    %c0_52 = arith.constant 0 : index
    %c3 = arith.constant 3 : index
    %c0_53 = arith.constant 0 : index
    %c0_54 = arith.constant 0 : index
    %88 = vector.load %arg8[%c0_52, %c3, %c0_53, %c0_54] : memref<1x4x8x128xf32, #tpu.memory_space<vmem>>, vector<1x1x8x128xf32>
    %89 = vector.shape_cast %88 : vector<1x1x8x128xf32> to vector<8x128xf32>
    %90 = vector.shape_cast %87 : vector<8x128xf32> to vector<1x8x128xf32>
    %cst_55 = arith.constant dense<0.000000e+00> : vector<8x128xf32>
    %91 = vector.multi_reduction <add>, %90, %cst_55 [0] : vector<1x8x128xf32> to vector<8x128xf32>
    %92 = arith.addf %89, %91 : vector<8x128xf32>
    %c0_56 = arith.constant 0 : index
    %c3_57 = arith.constant 3 : index
    %c0_58 = arith.constant 0 : index
    %c0_59 = arith.constant 0 : index
    %93 = vector.load %arg8[%c0_56, %c3_57, %c0_58, %c0_59] : memref<1x4x8x128xf32, #tpu.memory_space<vmem>>, vector<1x1x8x128xf32>
    %94 = vector.shape_cast %93 : vector<1x1x8x128xf32> to vector<8x128xf32>
    %95 = vector.shape_cast %92 : vector<8x128xf32> to vector<1x1x8x128xf32>
    tpu.vector_store %arg8[%c0_56, %c3_57, %c0_58, %c0_59], %95 {strides = array<i32>} : memref<1x4x8x128xf32, #tpu.memory_space<vmem>>, vector<1x1x8x128xf32>,
    return
  }
  func.func @transform_0(%arg0: i32, %arg1: i32, %arg2: memref<3xi32, #tpu.memory_space<smem>>) -> (i32, i32) {
    %c1_i32 = arith.constant 1 : i32
    %0 = arith.muli %arg0, %c1_i32 : i32
    %1 = arith.addi %0, %arg1 : i32
    %c0_i32 = arith.constant 0 : i32
    %c0_i32_0 = arith.constant 0 : i32
    return %1, %c0_i32 : i32, i32
  }
  func.func @transform_1(%arg0: i32, %arg1: i32, %arg2: memref<3xi32, #tpu.memory_space<smem>>) -> (i32, i32) {
    %c1_i32 = arith.constant 1 : i32
    %0 = arith.muli %arg0, %c1_i32 : i32
    %1 = arith.addi %0, %arg1 : i32
    %c0_i32 = arith.constant 0 : i32
    %c0_i32_0 = arith.constant 0 : i32
    return %1, %c0_i32 : i32, i32
  }
  func.func @transform_2(%arg0: i32, %arg1: i32, %arg2: memref<3xi32, #tpu.memory_space<smem>>) -> (i32, i32) {
    %c1_i32 = arith.constant 1 : i32
    %0 = arith.muli %arg0, %c1_i32 : i32
    %1 = arith.addi %0, %arg1 : i32
    %c0_i32 = arith.constant 0 : i32
    %c0_i32_0 = arith.constant 0 : i32
    return %1, %c0_i32 : i32, i32
  }
  func.func @transform_3(%arg0: i32, %arg1: i32, %arg2: memref<3xi32, #tpu.memory_space<smem>>) -> (i32, i32) {
    %c1_i32 = arith.constant 1 : i32
    %0 = arith.muli %arg0, %c1_i32 : i32
    %1 = arith.addi %0, %arg1 : i32
    %c0_i32 = arith.constant 0 : i32
    %c0_i32_0 = arith.constant 0 : i32
    return %1, %c0_i32 : i32, i32
  }
  func.func @transform_4(%arg0: i32, %arg1: i32, %arg2: memref<3xi32, #tpu.memory_space<smem>>) -> (i32, i32, i32) {
    %c1_i32 = arith.constant 1 : i32
    %0 = arith.muli %arg0, %c1_i32 : i32
    %1 = arith.addi %0, %arg1 : i32
    %c0_i32 = arith.constant 0 : i32
    %c0_i32_0 = arith.constant 0 : i32
    %c0_i32_1 = arith.constant 0 : i32
    return %c0_i32, %1, %c0_i32_0 : i32, i32, i32
  }
  func.func @transform_5(%arg0: i32, %arg1: i32, %arg2: memref<3xi32, #tpu.memory_space<smem>>) -> (i32, i32, i32, i32) {
    %c0_i32 = arith.constant 0 : i32
    %c0_i32_0 = arith.constant 0 : i32
    %c0_i32_1 = arith.constant 0 : i32
    %c0_i32_2 = arith.constant 0 : i32
    return %arg0, %c0_i32, %c0_i32_0, %c0_i32_1 : i32, i32, i32, i32
  }
}

</mosaic_0001>

<bundles_post_ra>
// kernel: tpu_custom_call.1
= control target key start
LH: loop header
LB: loop body
LE: loop exit
PB: predicated region body
PF: predicated region fallthrough
CT: control target
= control target key end

     0   :  { %s477_s24 = smov [#allocation3]   ;;  %s570_s0 = inlined_call_operand.hbm [shape: s32[3], index: 0, kind: input, shape index: {}]   ;;  %s571_s1 = inlined_call_operand.hbm [shape: f32[6,128], index: 1, kind: input, shape index: {}]   ;;  %s572_s2 = inlined_call_operand.hbm [shape: f32[6,128], index: 2, kind: input, shape index: {}]   ;;  %s573_s3 = inlined_call_operand.vmem [shape: f32[2,128], index: 3, kind: input, shape index: {}]   ;;  %s574_s4 = inlined_call_operand.hbm [shape: f32[2,128], index: 4, kind: input, shape index: {}]   ;;  %s575_s5 = inlined_call_operand.hbm [shape: f32[3,2,128], index: 5, kind: input, shape index: {}]   ;;  %s576_s6 = inlined_call_operand.hbm [shape: f32[1,4,8,128], index: 6, kind: output, shape index: {}]  }
   0x1   :  { %s12_s23 = sshll.u32 %s570_s0, 4  ;;  %s13_s23 = int_to_ptr.hbm [resolvable:$true] %s12_s23 }
   0x2   :  { %15 = dma.hbm_to_smem %s13_s23, 16, %s477_s24, [#allocation2] }
   0x3   :  { %467 = dma.done.wait [#allocation2], 16 }
   0x4   :  { %468 = vsyncadd [#allocation2], 4294967280 }
   0x5   :  { %18 = sfence }
   0x6   :  { %19 = vsyncpa [#allocation5], 0 }
   0x7   :  { %20 = vsyncpa [#allocation8], 0 }
   0x8   :  { %21 = vsyncpa [#allocation11], 0 }
   0x9   :  { %22 = vsyncpa [#allocation6], 0 }
   0xa   :  { %31 = vsyncadd [#allocation5], 256  ;;  %s36_s27 = sshll.u32 %s571_s1, 4  ;;  %s478_s28 = smov [#allocation4]   ;;  %s37_s27 = int_to_ptr.hbm [resolvable:$true] %s36_s27 }
   0xb   :  { %s38_s29 = sshll.u32 %s478_s28, 4  ;;  %s479_s0 = smov 128   ;;  %s39_s29 = int_to_ptr.vmem [resolvable:$true] %s38_s29 }
   0xc   :  { %s480_s30 = smov 8  }
   0xd   :  { %44 = dma.hbm_to_vmem [thread:$0]  %s37_s27, 128, %s39_s29, [#allocation5], %s479_s0, %s479_s0, %s480_s30  }
   0xe   :  { %53 = vsyncadd [#allocation8], 256  ;;  %s58_s9 = sshll.u32 %s572_s2, 4  ;;  %s481_s10 = smov [#allocation7]   ;;  %s59_s9 = int_to_ptr.hbm [resolvable:$true] %s58_s9 }
   0xf   :  { %s60_s11 = sshll.u32 %s481_s10, 4  ;;  %s61_s11 = int_to_ptr.vmem [resolvable:$true] %s60_s11 }
  0x10   :  { %66 = dma.hbm_to_vmem [thread:$0]  %s59_s9, 128, %s61_s11, [#allocation8], %s479_s0, %s479_s0, %s480_s30  }
  0x11   :  { %89 = vsyncadd [#allocation8], 96  ;;  %s94_s13 = sshll.u32 %s574_s4, 4  ;;  %s482_s14 = smov [#allocation9]   ;;  %s95_s13 = int_to_ptr.hbm [resolvable:$true] %s94_s13 }
  0x12   :  { %s96_s15 = sshll.u32 %s482_s14, 4  ;;  %s483_s16 = smov 32   ;;  %s97_s15 = int_to_ptr.vmem [resolvable:$true] %s96_s15 }
  0x13   :  { %s484_s17 = smov 2  }
  0x14   :  { %102 = dma.hbm_to_vmem [thread:$0]  %s95_s13, 32, %s97_s15, [#allocation8], %s483_s16, %s483_s16, %s484_s17  }
  0x15   :  { %111 = vsyncadd [#allocation11], 288  ;;  %s121_s2 = sld [smem:[#allocation0]]   ;;  %s129_s20 = sshll.u32 %s575_s5, 4  ;;  %s130_s20 = int_to_ptr.hbm [resolvable:$true] %s129_s20 }
  0x16   :  { %s485_s21 = smov [#allocation10]   ;;  %s486_s23 = smov 32  }
  0x17   :  { %s131_s22 = sshll.u32 %s485_s21, 4  ;;  %138 = sst [smem:[#allocation14]] %s486_s23  ;;  %s132_s22 = int_to_ptr.vmem [resolvable:$true] %s131_s22 }
  0x18   :  { %s487_s4 = smov 128   ;;  %s488_s25 = smov 1  }
  0x19   :  { %140 = sst [smem:[#allocation14 + $0x1]] %s487_s4  ;;  %s489_s27 = smov 2  }
  0x1a   :  { %142 = sst [smem:[#allocation14 + $0x2]] %s488_s25  ;;  %s490_s28 = smov [#allocation11]  }
  0x1b   :  { %s335_s24 = sshll.u32 %s121_s2, 26  ;;  %144 = sst [smem:[#allocation14 + $0x3]] %s486_s23 }
  0x1c   :  { %s336_s26 = sadd.s32 134217728, %s335_s24  ;;  %146 = sst [smem:[#allocation14 + $0x4]] %s486_s23 }
  0x1d   :  { %148 = sst [smem:[#allocation14 + $0x5]] %s489_s27  ;;  %s491_s29 = smov [#allocation13]  }
  0x1e   :  { %150 = dma.general %s130_s20, 96, %s132_s22, %s490_s28, %s491_s29, [#allocation14], %s336_s26, 0  }
  0x1f   :  { %469 = dma.done.wait [#allocation5], 384  }
  0x20   :  { %470 = vsyncadd [#allocation5], 4294966912 }
  0x21   :  { %471 = dma.done.wait [#allocation8], 512  }
  0x22   :  { %472 = vsyncadd [#allocation8], 4294966784 }
  0x23   :  { %473 = dma.done.wait [#allocation11], 384  }
  0x24   :  { %474 = vsyncadd [#allocation11], 4294966912  ;;  %v215_v0 = vlaneseq  ;;  %s204_s5 = sld [smem:[#allocation3]]  ;;  %v229_v9 = vld [vmem:[#allocation4] sm:$0xff]  ;;  %v230_v10 = vld [vmem:[#allocation4 + $0x8] sm:$0xff]  ;;  %v492_v34 = vmov 0.0  }
  0x25   :  { %s337_s7 = sld [smem:[#allocation3 + $0x1]]  ;;  %v231_v11 = vld [vmem:[#allocation4 + $0x10] sm:$0xff]  ;;  %v232_v15 = vld [vmem:[#allocation7] sm:$0xff]  ;;  %v233_v16 = vld [vmem:[#allocation7 + $0x8] sm:$0xff]  ;;  %s493_s10 = smov [#allocation12]  }
  0x26   :  { %v216_v1 = vshrl.u32 %v215_v0, 7  ;;  %v223_v2 = vand.u32 127, %v215_v0  ;;  %v234_v17 = vld [vmem:[#allocation7 + $0x10] sm:$0xff]  ;;  %v235_v19 = vsub.f32 %v229_v9, %v232_v15  ;;  %v236_v20 = vsub.f32 %v230_v10, %v233_v16  ;;  %v254_v22 = vld [vmem:[#allocation9] sm:$0xff]  ;;  %v260_v23 = vld [vmem:[%s573_s3] sm:$0xff]  ;;  %s338_s3 = sld [smem:[#allocation3 + $0x2]] }
  0x27   :  { %v237_v21 = vsub.f32 %v231_v11, %v234_v17  ;;  %v275_v24 = vld [vmem:[#allocation10] sm:$0xff]  ;;  %vm258_vm4 = vcmp.gt.f32.partialorder %v254_v22, 0.0  ;;  %v261_v25 = vsub.f32 %v260_v23, %v254_v22  ;;  %v277_v26 = vld [vmem:[#allocation10 + $0x8] sm:$0xff]  ;;  %v279_v27 = vld [vmem:[#allocation10 + $0x10] sm:$0xff]  ;;  %s312_s11 = sshll.u32 %s493_s10, 4  ;;  %s314_s13 = sshll.u32 %s576_s6, 4  ;;  %s313_s11 = int_to_ptr.vmem [resolvable:$true] %s312_s11  ;;  %s315_s13 = int_to_ptr.hbm [resolvable:$true] %s314_s13 }
  0x28   :  { %v217_v3 = vadd.s32 8, %v216_v1  ;;  %v218_v4 = vadd.s32 16, %v216_v1  ;;  %v219_v5 = vmul.u32 128, %v216_v1  ;;  %v242_v28 = vmul.f32 %v235_v19, %v235_v19 }
  0x29   :  { %v243_v29 = vmul.f32 %v236_v20, %v236_v20  ;;  %v244_v30 = vmul.f32 %v237_v21, %v237_v21  ;;  %v280_v32 = vmul.f32 %v275_v24, %v275_v24  ;;  %v262_v33 = vmul.f32 %v261_v25, %v261_v25 }
  0x2a   :  { %v220_v6 = vmul.u32 128, %v217_v3  ;;  %v221_v7 = vmul.u32 128, %v218_v4  ;;  %v224_v8 = vadd.s32 %v223_v2, %v219_v5  ;;  %v238_v12 = vstv %s204_s5 }
  0x2b   :  { %v256_v18 = vstv %s337_s7  ;;  %v281_v36 = vmul.f32 %v277_v26, %v277_v26  ;;  %v283_v37 = vmul.f32 %v279_v27, %v279_v27 }
  0x2c   :  { %v225_v13 = vadd.s32 %v223_v2, %v220_v6  ;;  %v226_v14 = vadd.s32 %v223_v2, %v221_v7  ;;  %vm239_vm0 = vcmp.lt.s32.totalorder %v224_v8, %v238_v12  ;;  %vm257_vm1 = vcmp.lt.s32.totalorder %v224_v8, %v256_v18 }
  0x2d   :  { %vm553_vm5 = vmand %vm257_vm1, %vm258_vm4  ;;  %v245_v38 = vsel %vm239_vm0, %v242_v28, 0.0  ;;  %v282_v43 = vadd.f32 %v281_v36, %v280_v32  ;;  %v299_v55 = vstv %s338_s3 }
  0x2e   :  { %vm240_vm2 = vcmp.lt.s32.totalorder %v225_v13, %v238_v12  ;;  %vm241_vm3 = vcmp.lt.s32.totalorder %v226_v14, %v238_v12  ;;  %v271_v35 = vsel %vm553_vm5, 1.0, %v492_v34  ;;  %v263_v42 = vsel %vm553_vm5, %v262_v33, 0.0 }
  0x2f   :  { %v246_v39 = vsel %vm240_vm2, %v243_v29, 0.0  ;;  %v247_v40 = vsel %vm241_vm3, %v244_v30, 0.0  ;;  %274 = vst [vmem:[#allocation12 + $0x10] sm:$0xff] %v271_v35  ;;  %v284_v45 = vadd.f32 %v283_v37, %v282_v43  ;;  %vm300_vm8 = vcmp.lt.s32.totalorder %v224_v8, %v299_v55 }
  0x30   :  { %v249_v41 = vadd.f32 %v246_v39, %v245_v38  ;;  %268 = vst [vmem:[#allocation12 + $0x8] sm:$0xff] %v263_v42 }
  0x31   :  { %357 = vrsqrt.f32 %v284_v45  ;;  %vm292_vm6 = vcmp.eq.f32.partialorder %v284_v45, inf  ;;  %v295_v52 = vand.u32 2147483648, %v284_v45  ;;  %vm294_vm7 = vcmp.eq.f32.partialorder %v284_v45, 0.0 }
  0x32   :  { %v250_v44 = vadd.f32 %v249_v41, %v247_v40 }
  0x34   :  { %252 = vst [vmem:[#allocation12] sm:$0xff] %v250_v44 }
  0x37   :  { %v358_v46 = vpop.eup %357 }
  0x38   :  { %v286_v47 = vmul.f32 %v358_v46, %v284_v45 }
  0x3a   :  { %v287_v48 = vmul.f32 %v358_v46, %v286_v47 }
  0x3c   :  { %v288_v49 = vmul.f32 0.5, %v287_v48 }
  0x3e   :  { %v289_v50 = vsub.f32 1.5, %v288_v49 }
  0x40   :  { %v290_v51 = vmul.f32 %v358_v46, %v289_v50 }
  0x42   :  { %v291_v53 = vmul.f32 %v290_v51, %v284_v45 }
  0x44   :  { %v293_v54 = vsel %vm292_vm6, %v284_v45, %v291_v53 }
  0x45   :  { %v296_v56 = vsel %vm294_vm7, %v295_v52, %v293_v54 }
  0x46   :  { %v339_v57 = vadd.f32 -1.0, %v296_v56 }
  0x48   :  { %v301_v58 = vmul.f32 %v339_v57, %v339_v57 }
  0x4a   :  { %v302_v59 = vsel %vm300_vm8, %v301_v58, 0.0 }
  0x4b   :  { %307 = vst [vmem:[#allocation12 + $0x18] sm:$0xff] %v302_v59 }
  0x4c   :  { %320 = dma.vmem_to_hbm [thread:$0]  %s313_s11, 512, %s315_s13, [#allocation6], %s479_s0, %s479_s0, %s480_s30  }
  0x4d   :  { %475 = dma.done.wait [#allocation6], 512  }
  0x4e   :  { %476 = vsyncadd [#allocation6], 4294966784 }
  0x4f   :  { %325 = vsyncpa [#allocation5], 1 }
  0x50   :  { %326 = vsyncpa [#allocation8], 1 }
  0x51   :  { %327 = vsyncpa [#allocation11], 1 }
  0x52   :  { %328 = vsyncpa [#allocation6], 1 }

</bundles_post_ra>
